<compile_context>
chip_gen: v7x
topology: tpu7x:2x2x1
jax: 0.10.0
libtpu: 0.0.40
codegen_flags: <defaults>
</compile_context>

<pallas_src>
import math

import jax
import jax.numpy as jnp
from jax.experimental import pallas as pl
from jax.experimental.pallas import tpu as pltpu


# ---------------------------------------------------------------------------
# Fused ResConv1d kernel: one grid step == one batch element, fully VMEM-resident.
# Layout inside the kernel: (L, C) with channels on lanes.
# ---------------------------------------------------------------------------
def _resconv1d_kernel(x_ref, w1_ref, s1_ref, w2_ref, s2_ref,
                      fc1w_ref, fc1b_ref, prelu_ref, fc2w_ref, fc2b_ref,
                      wsc_ref, ssc_ref, o_ref):
    xb = x_ref[0]                                        # (L, Cin) bf16 (cast in wrapper)

    def conv3(inp_bf16, w_ref):
        # kernel_size=3, padding=1 conv along L as three shifted matmuls (im2col taps).
        z = jnp.zeros((1, inp_bf16.shape[1]), jnp.bfloat16)
        prev = jnp.concatenate([z, inp_bf16[:-1, :]], axis=0)     # row l -> inp[l-1]
        nxt = jnp.concatenate([inp_bf16[1:, :], z], axis=0)       # row l -> inp[l+1]
        return (jnp.dot(prev, w_ref[0], preferred_element_type=jnp.float32)
                + jnp.dot(inp_bf16, w_ref[1], preferred_element_type=jnp.float32)
                + jnp.dot(nxt, w_ref[2], preferred_element_type=jnp.float32))

    # conv1 + folded BN1 + ReLU (f32 accumulation, activation kept as bf16 MXU operand)
    h = jnp.maximum(conv3(xb, w1_ref) + s1_ref[...], 0.0).astype(jnp.bfloat16)
    # conv2 + folded BN2
    r = conv3(h, w2_ref) + s2_ref[...]                            # (L, Cout) f32

    # --- SELayer: global average pool over L, 2-layer MLP with PReLU + sigmoid
    y = jnp.mean(r, axis=0, keepdims=True)                        # (1, Cout)
    y = jnp.dot(y.astype(jnp.bfloat16), fc1w_ref[...],
                preferred_element_type=jnp.float32) + fc1b_ref[...]
    y = jnp.where(y >= 0.0, y, prelu_ref[...] * y)                # PReLU
    y = jnp.dot(y.astype(jnp.bfloat16), fc2w_ref[...],
                preferred_element_type=jnp.float32) + fc2b_ref[...]
    y = pl.reciprocal(1.0 + jnp.exp(-y), approx=True)             # sigmoid via EUP
    r = r * y                                                     # channel re-weight

    # --- shortcut branch: 1x1 conv + folded BN3
    sc = jnp.dot(xb, wsc_ref[...], preferred_element_type=jnp.float32) + ssc_ref[...]

    o_ref[0] = jnp.maximum(r + sc, 0.0)                           # final ReLU


# ---------------------------------------------------------------------------
# Wrapper: folds BN/bias into weights, lays everything out channel-last bf16,
# launches the single fused kernel with a batch ("parallel") grid.
# ---------------------------------------------------------------------------
def res_conv1d_forward(x, p, eps=1e-5):
    B, Cin, L = x.shape
    Cout = p["w1"].shape[0]
    H = p["fc1w"].shape[0]

    def fold(w, b, g, be, m, v):
        # BN(conv(x)+b) == conv_with(w*scale)(x) + shift
        scale = g / jnp.sqrt(v + eps)
        w_eff = w * scale[:, None, None]
        shift = be + (b - m) * scale
        return w_eff, shift

    w1e, s1 = fold(p["w1"], p["b1"], p["g1"], p["be1"], p["m1"], p["v1"])
    w2e, s2 = fold(p["w2"], p["b2"], p["g2"], p["be2"], p["m2"], p["v2"])
    wsce, s3 = fold(p["wsc"], p["bsc"], p["g3"], p["be3"], p["m3"], p["v3"])

    # conv taps: (Cout, Cin, 3) -> (3, Cin, Cout), bf16 MXU operands
    w1k = jnp.transpose(w1e, (2, 1, 0)).astype(jnp.bfloat16)
    w2k = jnp.transpose(w2e, (2, 1, 0)).astype(jnp.bfloat16)
    wsck = wsce[:, :, 0].T.astype(jnp.bfloat16)                   # (Cin, Cout)

    fc1wT = p["fc1w"].T.astype(jnp.bfloat16)                      # (Cout, H)
    fc2wT = p["fc2w"].T.astype(jnp.bfloat16)                      # (H, Cout)
    fc1b = p["fc1b"][None, :].astype(jnp.float32)
    fc2b = p["fc2b"][None, :].astype(jnp.float32)
    prelu = jnp.broadcast_to(p["prelu"].astype(jnp.float32), (1, H))

    # channel-last bf16 input: halves the per-step input DMA, matches MXU operand dtype
    x_t = jnp.transpose(x, (0, 2, 1)).astype(jnp.bfloat16)        # (B, L, Cin)

    out = pl.pallas_call(
        _resconv1d_kernel,
        out_shape=jax.ShapeDtypeStruct((B, L, Cout), jnp.float32),
        grid=(B,),
        in_specs=[
            pl.BlockSpec((1, L, Cin), lambda b: (b, 0, 0)),       # x (per batch element)
            pl.BlockSpec((3, Cin, Cout), lambda b: (0, 0, 0)),    # conv1 taps (BN1-folded)
            pl.BlockSpec((1, Cout), lambda b: (0, 0)),            # shift1
            pl.BlockSpec((3, Cout, Cout), lambda b: (0, 0, 0)),   # conv2 taps (BN2-folded)
            pl.BlockSpec((1, Cout), lambda b: (0, 0)),            # shift2
            pl.BlockSpec((Cout, H), lambda b: (0, 0)),            # SE fc1 weight^T
            pl.BlockSpec((1, H), lambda b: (0, 0)),               # SE fc1 bias
            pl.BlockSpec((1, H), lambda b: (0, 0)),               # PReLU slope (broadcast)
            pl.BlockSpec((H, Cout), lambda b: (0, 0)),            # SE fc2 weight^T
            pl.BlockSpec((1, Cout), lambda b: (0, 0)),            # SE fc2 bias
            pl.BlockSpec((Cin, Cout), lambda b: (0, 0)),          # shortcut 1x1 conv (BN3-folded)
            pl.BlockSpec((1, Cout), lambda b: (0, 0)),            # shift3
        ],
        out_specs=pl.BlockSpec((1, L, Cout), lambda b: (b, 0, 0)),
        compiler_params=pltpu.CompilerParams(
            dimension_semantics=("parallel",)),
    )(x_t, w1k, s1[None, :], w2k, s2[None, :],
      fc1wT, fc1b, prelu, fc2wT, fc2b, wsck, s3[None, :])

    return jnp.transpose(out, (0, 2, 1))                          # (B, Cout, L)


# ---------------------------------------------------------------------------
# Pure-JAX (f32) reference of the same module semantics, for a correctness check.
# ---------------------------------------------------------------------------
def _ref_forward(x, p, eps=1e-5):
    def conv(xi, w, b, pad):
        out = jax.lax.conv_general_dilated(
            xi, w, window_strides=(1,), padding=[(pad, pad)],
            dimension_numbers=("NCH", "OIH", "NCH"))
        return out + b[None, :, None]

    def bn(xi, g, be, m, v):
        return (xi - m[None, :, None]) * (g / jnp.sqrt(v + eps))[None, :, None] \
            + be[None, :, None]

    r = jnp.maximum(bn(conv(x, p["w1"], p["b1"], 1),
                       p["g1"], p["be1"], p["m1"], p["v1"]), 0.0)
    r = bn(conv(r, p["w2"], p["b2"], 1), p["g2"], p["be2"], p["m2"], p["v2"])
    # SELayer
    y = jnp.mean(r, axis=2)                                       # (B, C)
    y = y @ p["fc1w"].T + p["fc1b"]
    y = jnp.where(y >= 0.0, y, p["prelu"] * y)
    y = y @ p["fc2w"].T + p["fc2b"]
    y = jax.nn.sigmoid(y)
    r = r * y[:, :, None]
    # shortcut
    sc = bn(conv(x, p["wsc"], p["bsc"], 0), p["g3"], p["be3"], p["m3"], p["v3"])
    return jnp.maximum(r + sc, 0.0)


# ---------------------------------------------------------------------------
if __name__ == "__main__":
    # Small shapes consistent with the module; C_out = 128 keeps outputs lane-dense.
    B, Cin, Cout, L = 2, 16, 128, 32
    H = Cout  # SELayer(_out, _out)

    keys = iter(jax.random.split(jax.random.PRNGKey(0), 32))

    def nk():
        return next(keys)

    def nrm(shape, std):
        return std * jax.random.normal(nk(), shape, dtype=jnp.float32)

    p = {
        "w1": nrm((Cout, Cin, 3), 1.0 / math.sqrt(3 * Cin)),
        "b1": nrm((Cout,), 0.05),
        "g1": 1.0 + nrm((Cout,), 0.1),
        "be1": nrm((Cout,), 0.1),
        "m1": nrm((Cout,), 0.1),
        "v1": 0.5 + jax.random.uniform(nk(), (Cout,), dtype=jnp.float32),
        "w2": nrm((Cout, Cout, 3), 1.0 / math.sqrt(3 * Cout)),
        "b2": nrm((Cout,), 0.05),
        "g2": 1.0 + nrm((Cout,), 0.1),
        "be2": nrm((Cout,), 0.1),
        "m2": nrm((Cout,), 0.1),
        "v2": 0.5 + jax.random.uniform(nk(), (Cout,), dtype=jnp.float32),
        "fc1w": nrm((H, Cout), 1.0 / math.sqrt(Cout)),
        "fc1b": nrm((H,), 0.05),
        "prelu": jnp.asarray(0.25, dtype=jnp.float32),
        "fc2w": nrm((Cout, H), 1.0 / math.sqrt(H)),
        "fc2b": nrm((Cout,), 0.05),
        "wsc": nrm((Cout, Cin, 1), 1.0 / math.sqrt(Cin)),
        "bsc": nrm((Cout,), 0.05),
        "g3": 1.0 + nrm((Cout,), 0.1),
        "be3": nrm((Cout,), 0.1),
        "m3": nrm((Cout,), 0.1),
        "v3": 0.5 + jax.random.uniform(nk(), (Cout,), dtype=jnp.float32),
    }
    x = jax.random.normal(nk(), (B, Cin, L), dtype=jnp.float32)

    # run the fused Pallas kernel (jitted end-to-end)
    out = jax.jit(res_conv1d_forward)(x, p)
    out = jax.block_until_ready(out)

    # verify against pure-JAX f32 reference (bf16 MXU operands -> loose tolerance)
    ref = _ref_forward(x, p)
    assert out.shape == (B, Cout, L)
    if not jnp.allclose(out, ref, atol=2e-2, rtol=2e-2):
        max_err = float(jnp.max(jnp.abs(out - ref)))
        raise AssertionError(f"mismatch vs reference, max abs err = {max_err}")

    print("KERNEL_OK")
</pallas_src>

<mosaic_0001>
module attributes {stable_mosaic.version = 11 : i64} {
  func.func @_resconv1d_kernel(%arg0: i32, %arg1: memref<1x32x16xbf16, #tpu.memory_space<vmem>>, %arg2: memref<3x16x128xbf16, #tpu.memory_space<vmem>>, %arg3: memref<1x128xf32, #tpu.memory_space<vmem>>, %arg4: memref<3x128x128xbf16, #tpu.memory_space<vmem>>, %arg5: memref<1x128xf32, #tpu.memory_space<vmem>>, %arg6: memref<128x128xbf16, #tpu.memory_space<vmem>>, %arg7: memref<1x128xf32, #tpu.memory_space<vmem>>, %arg8: memref<1x128xf32, #tpu.memory_space<vmem>>, %arg9: memref<128x128xbf16, #tpu.memory_space<vmem>>, %arg10: memref<1x128xf32, #tpu.memory_space<vmem>>, %arg11: memref<16x128xbf16, #tpu.memory_space<vmem>>, %arg12: memref<1x128xf32, #tpu.memory_space<vmem>>, %arg13: memref<1x32x128xf32, #tpu.memory_space<vmem>>) attributes {dimension_semantics = [#tpu.dimension_semantics<parallel>], iteration_bounds = array<i64: 2>, scalar_prefetch = 0 : i64, scratch_operands = 0 : i64, tpu.core_type = #tpu.core_type<tc>, window_params = [{transform_indices = @transform_0, window_bounds = array<i64: 1, 32, 16>}, {pipeline_mode = #tpu.pipeline_mode<synchronous>, transform_indices = @transform_1, window_bounds = array<i64: 3, 16, 128>}, {pipeline_mode = #tpu.pipeline_mode<synchronous>, transform_indices = @transform_2, window_bounds = array<i64: 1, 128>}, {pipeline_mode = #tpu.pipeline_mode<synchronous>, transform_indices = @transform_3, window_bounds = array<i64: 3, 128, 128>}, {pipeline_mode = #tpu.pipeline_mode<synchronous>, transform_indices = @transform_4, window_bounds = array<i64: 1, 128>}, {pipeline_mode = #tpu.pipeline_mode<synchronous>, transform_indices = @transform_5, window_bounds = array<i64: 128, 128>}, {pipeline_mode = #tpu.pipeline_mode<synchronous>, transform_indices = @transform_6, window_bounds = array<i64: 1, 128>}, {pipeline_mode = #tpu.pipeline_mode<synchronous>, transform_indices = @transform_7, window_bounds = array<i64: 1, 128>}, {pipeline_mode = #tpu.pipeline_mode<synchronous>, transform_indices = @transform_8, window_bounds = array<i64: 128, 128>}, {pipeline_mode = #tpu.pipeline_mode<synchronous>, transform_indices = @transform_9, window_bounds = array<i64: 1, 128>}, {pipeline_mode = #tpu.pipeline_mode<synchronous>, transform_indices = @transform_10, window_bounds = array<i64: 16, 128>}, {pipeline_mode = #tpu.pipeline_mode<synchronous>, transform_indices = @transform_11, window_bounds = array<i64: 1, 128>}, {transform_indices = @transform_12, window_bounds = array<i64: 1, 32, 128>}]} {
    %c0 = arith.constant 0 : index
    %c0_0 = arith.constant 0 : index
    %c0_1 = arith.constant 0 : index
    %0 = vector.load %arg1[%c0, %c0_0, %c0_1] : memref<1x32x16xbf16, #tpu.memory_space<vmem>>, vector<1x32x16xbf16>
    %1 = vector.shape_cast %0 : vector<1x32x16xbf16> to vector<32x16xbf16>
    %cst = arith.constant 0.000000e+00 : bf16
    %2 = vector.broadcast %cst : bf16 to vector<1x16xbf16>
    %3 = vector.extract_strided_slice %1 {offsets = [0, 0], sizes = [31, 16], strides = [1, 1]} : vector<32x16xbf16> to vector<31x16xbf16>
    %4 = tpu.concatenate %2, %3 in 0 : vector<1x16xbf16>, vector<31x16xbf16> -> vector<32x16xbf16>
    %5 = vector.extract_strided_slice %1 {offsets = [1, 0], sizes = [31, 16], strides = [1, 1]} : vector<32x16xbf16> to vector<31x16xbf16>
    %6 = tpu.concatenate %5, %2 in 0 : vector<31x16xbf16>, vector<1x16xbf16> -> vector<32x16xbf16>
    %c0_2 = arith.constant 0 : index
    %c0_3 = arith.constant 0 : index
    %c0_4 = arith.constant 0 : index
    %7 = vector.load %arg2[%c0_2, %c0_3, %c0_4] : memref<3x16x128xbf16, #tpu.memory_space<vmem>>, vector<1x16x128xbf16>
    %8 = vector.shape_cast %7 : vector<1x16x128xbf16> to vector<16x128xbf16>
    %cst_5 = arith.constant dense<0.000000e+00> : vector<32x128xf32>
    %9 = tpu.matmul %4, %8, %cst_5 {dimension_numbers = #tpu.dot_dimension_numbers<[1], [0], [0], [1], [0, 0, 1, 1], [], []>} : vector<32x16xbf16>, vector<16x128xbf16>, vector<32x128xf32> -> vector<32x128xf32>
    %c1 = arith.constant 1 : index
    %c0_6 = arith.constant 0 : index
    %c0_7 = arith.constant 0 : index
    %10 = vector.load %arg2[%c1, %c0_6, %c0_7] : memref<3x16x128xbf16, #tpu.memory_space<vmem>>, vector<1x16x128xbf16>
    %11 = vector.shape_cast %10 : vector<1x16x128xbf16> to vector<16x128xbf16>
    %cst_8 = arith.constant dense<0.000000e+00> : vector<32x128xf32>
    %12 = tpu.matmul %1, %11, %cst_8 {dimension_numbers = #tpu.dot_dimension_numbers<[1], [0], [0], [1], [0, 0, 1, 1], [], []>} : vector<32x16xbf16>, vector<16x128xbf16>, vector<32x128xf32> -> vector<32x128xf32>
    %13 = arith.addf %9, %12 : vector<32x128xf32>
    %c2 = arith.constant 2 : index
    %c0_9 = arith.constant 0 : index
    %c0_10 = arith.constant 0 : index
    %14 = vector.load %arg2[%c2, %c0_9, %c0_10] : memref<3x16x128xbf16, #tpu.memory_space<vmem>>, vector<1x16x128xbf16>
    %15 = vector.shape_cast %14 : vector<1x16x128xbf16> to vector<16x128xbf16>
    %cst_11 = arith.constant dense<0.000000e+00> : vector<32x128xf32>
    %16 = tpu.matmul %6, %15, %cst_11 {dimension_numbers = #tpu.dot_dimension_numbers<[1], [0], [0], [1], [0, 0, 1, 1], [], []>} : vector<32x16xbf16>, vector<16x128xbf16>, vector<32x128xf32> -> vector<32x128xf32>
    %17 = arith.addf %13, %16 : vector<32x128xf32>
    %c0_12 = arith.constant 0 : index
    %c0_13 = arith.constant 0 : index
    %18 = vector.load %arg3[%c0_12, %c0_13] : memref<1x128xf32, #tpu.memory_space<vmem>>, vector<1x128xf32>
    %19 = vector.broadcast %18 : vector<1x128xf32> to vector<32x128xf32>
    %20 = arith.addf %17, %19 : vector<32x128xf32>
    %cst_14 = arith.constant 0.000000e+00 : f32
    %21 = vector.broadcast %cst_14 : f32 to vector<32x128xf32>
    %22 = arith.maximumf %20, %21 : vector<32x128xf32>
    %23 = arith.truncf %22 : vector<32x128xf32> to vector<32x128xbf16>
    %cst_15 = arith.constant 0.000000e+00 : bf16
    %24 = vector.broadcast %cst_15 : bf16 to vector<1x128xbf16>
    %25 = vector.extract_strided_slice %23 {offsets = [0, 0], sizes = [31, 128], strides = [1, 1]} : vector<32x128xbf16> to vector<31x128xbf16>
    %26 = tpu.concatenate %24, %25 in 0 : vector<1x128xbf16>, vector<31x128xbf16> -> vector<32x128xbf16>
    %27 = vector.extract_strided_slice %23 {offsets = [1, 0], sizes = [31, 128], strides = [1, 1]} : vector<32x128xbf16> to vector<31x128xbf16>
    %28 = tpu.concatenate %27, %24 in 0 : vector<31x128xbf16>, vector<1x128xbf16> -> vector<32x128xbf16>
    %c0_16 = arith.constant 0 : index
    %c0_17 = arith.constant 0 : index
    %c0_18 = arith.constant 0 : index
    %29 = vector.load %arg4[%c0_16, %c0_17, %c0_18] : memref<3x128x128xbf16, #tpu.memory_space<vmem>>, vector<1x128x128xbf16>
    %30 = vector.shape_cast %29 : vector<1x128x128xbf16> to vector<128x128xbf16>
    %cst_19 = arith.constant dense<0.000000e+00> : vector<32x128xf32>
    %31 = tpu.matmul %26, %30, %cst_19 {dimension_numbers = #tpu.dot_dimension_numbers<[1], [0], [0], [1], [0, 0, 1, 1], [], []>} : vector<32x128xbf16>, vector<128x128xbf16>, vector<32x128xf32> -> vector<32x128xf32>
    %c1_20 = arith.constant 1 : index
    %c0_21 = arith.constant 0 : index
    %c0_22 = arith.constant 0 : index
    %32 = vector.load %arg4[%c1_20, %c0_21, %c0_22] : memref<3x128x128xbf16, #tpu.memory_space<vmem>>, vector<1x128x128xbf16>
    %33 = vector.shape_cast %32 : vector<1x128x128xbf16> to vector<128x128xbf16>
    %cst_23 = arith.constant dense<0.000000e+00> : vector<32x128xf32>
    %34 = tpu.matmul %23, %33, %cst_23 {dimension_numbers = #tpu.dot_dimension_numbers<[1], [0], [0], [1], [0, 0, 1, 1], [], []>} : vector<32x128xbf16>, vector<128x128xbf16>, vector<32x128xf32> -> vector<32x128xf32>
    %35 = arith.addf %31, %34 : vector<32x128xf32>
    %c2_24 = arith.constant 2 : index
    %c0_25 = arith.constant 0 : index
    %c0_26 = arith.constant 0 : index
    %36 = vector.load %arg4[%c2_24, %c0_25, %c0_26] : memref<3x128x128xbf16, #tpu.memory_space<vmem>>, vector<1x128x128xbf16>
    %37 = vector.shape_cast %36 : vector<1x128x128xbf16> to vector<128x128xbf16>
    %cst_27 = arith.constant dense<0.000000e+00> : vector<32x128xf32>
    %38 = tpu.matmul %28, %37, %cst_27 {dimension_numbers = #tpu.dot_dimension_numbers<[1], [0], [0], [1], [0, 0, 1, 1], [], []>} : vector<32x128xbf16>, vector<128x128xbf16>, vector<32x128xf32> -> vector<32x128xf32>
    %39 = arith.addf %35, %38 : vector<32x128xf32>
    %c0_28 = arith.constant 0 : index
    %c0_29 = arith.constant 0 : index
    %40 = vector.load %arg5[%c0_28, %c0_29] : memref<1x128xf32, #tpu.memory_space<vmem>>, vector<1x128xf32>
    %41 = vector.broadcast %40 : vector<1x128xf32> to vector<32x128xf32>
    %42 = arith.addf %39, %41 : vector<32x128xf32>
    %cst_30 = arith.constant dense<0.000000e+00> : vector<128xf32>
    %43 = vector.multi_reduction <add>, %42, %cst_30 [0] : vector<32x128xf32> to vector<128xf32>
    %44 = vector.shape_cast %43 : vector<128xf32> to vector<1x128xf32>
    %cst_31 = arith.constant 3.200000e+01 : f32
    %45 = vector.broadcast %cst_31 : f32 to vector<1x128xf32>
    %46 = arith.divf %44, %45 : vector<1x128xf32>
    %47 = arith.truncf %46 : vector<1x128xf32> to vector<1x128xbf16>
    %c0_32 = arith.constant 0 : index
    %c0_33 = arith.constant 0 : index
    %48 = vector.load %arg6[%c0_32, %c0_33] : memref<128x128xbf16, #tpu.memory_space<vmem>>, vector<128x128xbf16>
    %cst_34 = arith.constant dense<0.000000e+00> : vector<1x128xf32>
    %49 = tpu.matmul %47, %48, %cst_34 {dimension_numbers = #tpu.dot_dimension_numbers<[1], [0], [0], [1], [0, 0, 1, 1], [], []>} : vector<1x128xbf16>, vector<128x128xbf16>, vector<1x128xf32> -> vector<1x128xf32>
    %c0_35 = arith.constant 0 : index
    %c0_36 = arith.constant 0 : index
    %50 = vector.load %arg7[%c0_35, %c0_36] : memref<1x128xf32, #tpu.memory_space<vmem>>, vector<1x128xf32>
    %51 = arith.addf %49, %50 : vector<1x128xf32>
    %cst_37 = arith.constant 0.000000e+00 : f32
    %52 = vector.broadcast %cst_37 : f32 to vector<1x128xf32>
    %53 = arith.cmpf oge, %51, %52 : vector<1x128xf32>
    %c0_38 = arith.constant 0 : index
    %c0_39 = arith.constant 0 : index
    %54 = vector.load %arg8[%c0_38, %c0_39] : memref<1x128xf32, #tpu.memory_space<vmem>>, vector<1x128xf32>
    %55 = arith.mulf %54, %51 : vector<1x128xf32>
    %56 = arith.select %53, %51, %55 : vector<1x128xi1>, vector<1x128xf32>
    %57 = arith.truncf %56 : vector<1x128xf32> to vector<1x128xbf16>
    %c0_40 = arith.constant 0 : index
    %c0_41 = arith.constant 0 : index
    %58 = vector.load %arg9[%c0_40, %c0_41] : memref<128x128xbf16, #tpu.memory_space<vmem>>, vector<128x128xbf16>
    %cst_42 = arith.constant dense<0.000000e+00> : vector<1x128xf32>
    %59 = tpu.matmul %57, %58, %cst_42 {dimension_numbers = #tpu.dot_dimension_numbers<[1], [0], [0], [1], [0, 0, 1, 1], [], []>} : vector<1x128xbf16>, vector<128x128xbf16>, vector<1x128xf32> -> vector<1x128xf32>
    %c0_43 = arith.constant 0 : index
    %c0_44 = arith.constant 0 : index
    %60 = vector.load %arg10[%c0_43, %c0_44] : memref<1x128xf32, #tpu.memory_space<vmem>>, vector<1x128xf32>
    %61 = arith.addf %59, %60 : vector<1x128xf32>
    %cst_45 = arith.constant 0.000000e+00 : f32
    %62 = vector.broadcast %cst_45 : f32 to vector<1x128xf32>
    %63 = arith.subf %62, %61 : vector<1x128xf32>
    %64 = math.exp %63 : vector<1x128xf32>
    %cst_46 = arith.constant 1.000000e+00 : f32
    %65 = vector.broadcast %cst_46 : f32 to vector<1x128xf32>
    %66 = arith.addf %65, %64 : vector<1x128xf32>
    %67 = tpu.reciprocal %66 {approx = true} : vector<1x128xf32> -> vector<1x128xf32>
    %68 = vector.broadcast %67 : vector<1x128xf32> to vector<32x128xf32>
    %69 = arith.mulf %42, %68 : vector<32x128xf32>
    %c0_47 = arith.constant 0 : index
    %c0_48 = arith.constant 0 : index
    %70 = vector.load %arg11[%c0_47, %c0_48] : memref<16x128xbf16, #tpu.memory_space<vmem>>, vector<16x128xbf16>
    %cst_49 = arith.constant dense<0.000000e+00> : vector<32x128xf32>
    %71 = tpu.matmul %1, %70, %cst_49 {dimension_numbers = #tpu.dot_dimension_numbers<[1], [0], [0], [1], [0, 0, 1, 1], [], []>} : vector<32x16xbf16>, vector<16x128xbf16>, vector<32x128xf32> -> vector<32x128xf32>
    %c0_50 = arith.constant 0 : index
    %c0_51 = arith.constant 0 : index
    %72 = vector.load %arg12[%c0_50, %c0_51] : memref<1x128xf32, #tpu.memory_space<vmem>>, vector<1x128xf32>
    %73 = vector.broadcast %72 : vector<1x128xf32> to vector<32x128xf32>
    %74 = arith.addf %71, %73 : vector<32x128xf32>
    %75 = arith.addf %69, %74 : vector<32x128xf32>
    %cst_52 = arith.constant 0.000000e+00 : f32
    %76 = vector.broadcast %cst_52 : f32 to vector<32x128xf32>
    %77 = arith.maximumf %75, %76 : vector<32x128xf32>
    %c0_53 = arith.constant 0 : index
    %c0_54 = arith.constant 0 : index
    %c0_55 = arith.constant 0 : index
    %78 = vector.load %arg13[%c0_53, %c0_54, %c0_55] : memref<1x32x128xf32, #tpu.memory_space<vmem>>, vector<1x32x128xf32>
    %79 = vector.shape_cast %78 : vector<1x32x128xf32> to vector<32x128xf32>
    %80 = vector.shape_cast %77 : vector<32x128xf32> to vector<1x32x128xf32>
    tpu.vector_store %arg13[%c0_53, %c0_54, %c0_55], %80 {strides = array<i32>} : memref<1x32x128xf32, #tpu.memory_space<vmem>>, vector<1x32x128xf32>,
    return
  }
  func.func @transform_0(%arg0: i32) -> (i32, i32, i32) {
    %c0_i32 = arith.constant 0 : i32
    %c0_i32_0 = arith.constant 0 : i32
    %c0_i32_1 = arith.constant 0 : i32
    return %arg0, %c0_i32, %c0_i32_0 : i32, i32, i32
  }
  func.func @transform_1(%arg0: i32) -> (i32, i32, i32) {
    %c0_i32 = arith.constant 0 : i32
    %c0_i32_0 = arith.constant 0 : i32
    %c0_i32_1 = arith.constant 0 : i32
    %c0_i32_2 = arith.constant 0 : i32
    return %c0_i32, %c0_i32_0, %c0_i32_1 : i32, i32, i32
  }
  func.func @transform_2(%arg0: i32) -> (i32, i32) {
    %c0_i32 = arith.constant 0 : i32
    %c0_i32_0 = arith.constant 0 : i32
    %c0_i32_1 = arith.constant 0 : i32
    return %c0_i32, %c0_i32_0 : i32, i32
  }
  func.func @transform_3(%arg0: i32) -> (i32, i32, i32) {
    %c0_i32 = arith.constant 0 : i32
    %c0_i32_0 = arith.constant 0 : i32
    %c0_i32_1 = arith.constant 0 : i32
    %c0_i32_2 = arith.constant 0 : i32
    return %c0_i32, %c0_i32_0, %c0_i32_1 : i32, i32, i32
  }
  func.func @transform_4(%arg0: i32) -> (i32, i32) {
    %c0_i32 = arith.constant 0 : i32
    %c0_i32_0 = arith.constant 0 : i32
    %c0_i32_1 = arith.constant 0 : i32
    return %c0_i32, %c0_i32_0 : i32, i32
  }
  func.func @transform_5(%arg0: i32) -> (i32, i32) {
    %c0_i32 = arith.constant 0 : i32
    %c0_i32_0 = arith.constant 0 : i32
    %c0_i32_1 = arith.constant 0 : i32
    return %c0_i32, %c0_i32_0 : i32, i32
  }
  func.func @transform_6(%arg0: i32) -> (i32, i32) {
    %c0_i32 = arith.constant 0 : i32
    %c0_i32_0 = arith.constant 0 : i32
    %c0_i32_1 = arith.constant 0 : i32
    return %c0_i32, %c0_i32_0 : i32, i32
  }
  func.func @transform_7(%arg0: i32) -> (i32, i32) {
    %c0_i32 = arith.constant 0 : i32
    %c0_i32_0 = arith.constant 0 : i32
    %c0_i32_1 = arith.constant 0 : i32
    return %c0_i32, %c0_i32_0 : i32, i32
  }
  func.func @transform_8(%arg0: i32) -> (i32, i32) {
    %c0_i32 = arith.constant 0 : i32
    %c0_i32_0 = arith.constant 0 : i32
    %c0_i32_1 = arith.constant 0 : i32
    return %c0_i32, %c0_i32_0 : i32, i32
  }
  func.func @transform_9(%arg0: i32) -> (i32, i32) {
    %c0_i32 = arith.constant 0 : i32
    %c0_i32_0 = arith.constant 0 : i32
    %c0_i32_1 = arith.constant 0 : i32
    return %c0_i32, %c0_i32_0 : i32, i32
  }
  func.func @transform_10(%arg0: i32) -> (i32, i32) {
    %c0_i32 = arith.constant 0 : i32
    %c0_i32_0 = arith.constant 0 : i32
    %c0_i32_1 = arith.constant 0 : i32
    return %c0_i32, %c0_i32_0 : i32, i32
  }
  func.func @transform_11(%arg0: i32) -> (i32, i32) {
    %c0_i32 = arith.constant 0 : i32
    %c0_i32_0 = arith.constant 0 : i32
    %c0_i32_1 = arith.constant 0 : i32
    return %c0_i32, %c0_i32_0 : i32, i32
  }
  func.func @transform_12(%arg0: i32) -> (i32, i32, i32) {
    %c0_i32 = arith.constant 0 : i32
    %c0_i32_0 = arith.constant 0 : i32
    %c0_i32_1 = arith.constant 0 : i32
    return %arg0, %c0_i32, %c0_i32_0 : i32, i32, i32
  }
}

</mosaic_0001>

<bundles_post_ra>
// kernel: res_conv1d_forward.1
= control target key start
LH: loop header
LB: loop body
LE: loop exit
PB: predicated region body
PF: predicated region fallthrough
CT: control target
= control target key end

     0   :  { %17 = vsyncpa [#allocation3], 0  ;;  %s2322_s0 = inlined_call_operand.vmem [shape: bf16[2,32,16], index: 0, kind: input, shape index: {}]   ;;  %s2323_s1 = inlined_call_operand.vmem [shape: bf16[3,16,128], index: 1, kind: input, shape index: {}]   ;;  %s2324_s2 = inlined_call_operand.vmem [shape: f32[1,128], index: 2, kind: input, shape index: {}]   ;;  %s2325_s3 = inlined_call_operand.vmem [shape: bf16[3,128,128], index: 3, kind: input, shape index: {}]   ;;  %s2326_s4 = inlined_call_operand.vmem [shape: f32[1,128], index: 4, kind: input, shape index: {}]   ;;  %s2327_s5 = inlined_call_operand.vmem [shape: bf16[128,128], index: 5, kind: input, shape index: {}]   ;;  %s2328_s6 = inlined_call_operand.vmem [shape: f32[1,128], index: 6, kind: input, shape index: {}]   ;;  %s2329_s7 = inlined_call_operand.vmem [shape: f32[1,128], index: 7, kind: input, shape index: {}]   ;;  %s2330_s8 = inlined_call_operand.vmem [shape: bf16[128,128], index: 8, kind: input, shape index: {}]   ;;  %s2331_s9 = inlined_call_operand.vmem [shape: f32[1,128], index: 9, kind: input, shape index: {}]   ;;  %s2332_s10 = inlined_call_operand.vmem [shape: bf16[16,128], index: 10, kind: input, shape index: {}]   ;;  %s2333_s11 = inlined_call_operand.vmem [shape: f32[1,128], index: 11, kind: input, shape index: {}]   ;;  %s2334_s12 = inlined_call_operand.hbm [shape: f32[2,32,128], index: 12, kind: output, shape index: {}]  }
   0x1   :  { %19 = vsyncpa [#allocation3 + $0x1], 0  ;;  %s1976_s21 = smov 0   ;;  %s1978_s22 = smov 0  }
   0x2   :  { %s1980_s23 = smov 0   ;;  %s1982_s24 = smov 0  }
   0x3 LB: > { %2336 = sst [smem:[#allocation5_spill]] %s1900_s23  ;;  %s1997_s25 = sadd.s32 4294967295, %s1904_s24   ;;  %s1904_s24 = sphi %s1982_s24, %s2348_s24   ;;  %s1900_s23 = sphi %s1980_s23, %s2345_s23   ;;  %s1896_s22 = sphi %s1978_s22, %s2347_s22   ;;  %s1892_s21 = sphi %s1976_s21, %s2346_s21  }
   0x4   : > { %s1442_s26 = sadd.s32 4294967294, %s1904_s24   ;;  %s2001_s27 = sadd.s32 1, %s1904_s24  }
   0x5   : > { %s289_s28 = sadd.s32 1, %s1900_s23  ;;  %s286_s29 = ssub.s32 %s1904_s24, %s2001_s27 }
   0x6   : > { %p299_p0 = scmp.ne.s32.totalorder %s1900_s23, %s1896_s22  ;;  %p287_p1 = scmp.eq.s32.totalorder %s286_s29, 0 }
   0x7   : > { %p300_p2 = scmp.eq.s32.totalorder %s1997_s25, 1  ;;  %p305_p3 = scmp.ne.s32.totalorder %s1896_s22, %s1892_s21 }
   0x8   : > { %p306_p4 = scmp.eq.s32.totalorder %s1442_s26, 1  ;;  %p1445_p7 = scmp.ge.s32.totalorder %s1904_s24, 1 }
   0x9   : > { %s2012_s30 = scalar_select %p287_p1, %s1900_s23, %s289_s28  }
   0xa   : > { %p2014_p5 = por %p300_p2, %p299_p0  ;;  %p2018_p6 = por %p306_p4, %p305_p3 }
   0xb   : > { %2337 = sst [smem:[#allocation6_spill]] %s2012_s30  ;;  %p365_p8 = scmp.lt.s32.totalorder %s1904_s24, 3 }
   0xd   : > { %p366_p9 = pnand %p1445_p7, %p365_p8 }
   0xe   : > { %v1792_v0 = vld [vmem:[%s2323_s1 + $0x8] sm:$0xff] (!%p366_p9)   ;;  %p407_p10 = scmp.lt.s32.totalorder (!%p366_p9), %s1997_s25, 1  ;;  %v1794_v1 = vld [vmem:[%s2323_s1] sm:$0xff] (!%p366_p9)   ;;  %vm427_vm0 = vsmask.f32 (!%p366_p9), 256  ;;  %vm468_vm2 = vcmask (!%p366_p9), 130048  }
   0xf   : > { %369 = sbr.rel (%p366_p9) target bundleno = 1062 (0x426), region = 68  ;;  %1609 = vmatprep.subr.bf16.mxu0 (!%p366_p9), %v1792_v0  ;;  %vm447_vm1 = vsmask.f32 (!%p366_p9), 7424  ;;  %v1796_v2 = vld [vmem:[%s2323_s1 + $0x10] sm:$0xff] (!%p366_p9)   ;;  %v1797_v3 = vld [vmem:[%s2325_s3 + $0x40] sm:$0xff] (!%p366_p9)   ;;  %vm444_vm3 = vcmask (!%p366_p9), 1040384  }
  0x10   : > { %1610 = vmatpush3.bf16.msra.mxu0 (!%p366_p9), %v1792_v0  ;;  %vm454_vm4 = vcmask (!%p366_p9), 1047552   ;;  %1627 = vmatprep.subr.bf16.mxu1 (!%p366_p9), %v1797_v3  ;;  %v1798_v8 = vld [vmem:[%s2325_s3 + $0x48] sm:$0xff] (!%p366_p9)   ;;  %v1799_v9 = vld [vmem:[%s2325_s3 + $0x50] sm:$0xff] (!%p366_p9)   ;;  %vm2061_vm5 = vmand (!%p366_p9), %vm444_vm3, %vm427_vm0  ;;  %v1906_v33 = vmov (!%p366_p9), 0.0   ;;  %vm1907_vm7 = vmmov (!%p366_p9), 0   ;;  %s404_s23 = sand.u32 (!%p366_p9), 1, %s1896_s22  }
  0x11   : > { %1615 = vmatprep.subr.bf16.mxu0 (!%p366_p9), %v1794_v1  ;;  %1628 = vmatpush3.bf16.msra.mxu1 (!%p366_p9), %v1797_v3  ;;  %vm2067_vm6 = vmand (!%p366_p9), %vm454_vm4, %vm447_vm1  ;;  %v1800_v19 = vld [vmem:[%s2325_s3 + $0x58] sm:$0xff] (!%p366_p9)   ;;  %v1801_v25 = vld [vmem:[%s2325_s3 + $0x60] sm:$0xff] (!%p366_p9)   ;;  %s1446_s30 = sshll.u32 (!%p366_p9), %s404_s23, 5 }
  0x12   : > { %1629 = vmatprep.subr.bf16.mxu1 (!%p366_p9), %v1798_v8  ;;  %v1802_v28 = vld [vmem:[%s2325_s3 + $0x68] sm:$0xff] (!%p366_p9)   ;;  %v1803_v29 = vld [vmem:[%s2325_s3 + $0x70] sm:$0xff] (!%p366_p9)   ;;  %v1804_v30 = vld [vmem:[%s2325_s3 + $0x78] sm:$0xff] (!%p366_p9)   ;;  %s406_s26 = scalar_lea.vmem (!%p366_p9), [#allocation2], %s1446_s30  ;;  %s1908_s30 = smov (!%p366_p9), [#allocation2]  }
  0x13   : > { %v1805_v31 = vld [vmem:[%s2325_s3] sm:$0xff] (!%p366_p9)   ;;  %v1806_v50 = vld [vmem:[%s2325_s3 + $0x8] sm:$0xff] (!%p366_p9)   ;;  %v1807_v57 = vld [vmem:[%s2325_s3 + $0x10] sm:$0xff] (!%p366_p9)   ;;  %s1380_s28 = sshll.u32 (!%p366_p9), %s406_s26, 4  ;;  %s2272_s28 = int_to_ptr.vmem [resolvable:$true] %s1380_s28 }
  0x14   : > { %v1821_v32 = vld [vmem:[%s2327_s5] sm:$0xff] (!%p366_p9)   ;;  %v1810_v3 = vld [vmem:[%s2325_s3 + $0x28] sm:$0xff] (!%p366_p9)   ;;  %v1824_v17 = vld [vmem:[%s2327_s5 + $0x18] sm:$0xff] (!%p366_p9)   ;;  %s1842_s18 = scalar_lea.vmem (!%p366_p9), %s2272_s28, 512 }
  0x15   : > { %1630 = vmatpush3.bf16.msra.mxu1 (!%p366_p9), %v1798_v8  ;;  %v1464_v34 = vld [vmem:[%s2324_s2] ss:$0 sm:$0xff] (!%p366_p9)  ;;  %v1818_v13 = vld [vmem:[%s2325_s3 + $0xa8] sm:$0xff] (!%p366_p9)   ;;  %p1843_p11 = scmp.ne.s32.totalorder (!%p366_p9), %s2272_s28, %s1842_s18 }
  0x16   : > { %s408_s19 = scalar_select %p407_p10, %s1997_s25, 1  ;;  %1631 = vmatprep.subr.bf16.mxu1 %v1799_v9  ;;  %v1813_v8 = vld [vmem:[%s2325_s3 + $0x80] sm:$0xff]  }
  0x17   : > { %p1844_p12 = pnand %p1843_p11, %p2014_p5 }
  0x18   : > { %s1547_s20 = sshll.u32 %s408_s19, 4  ;;  %s1846_s19 = sshll.u32 %s1908_s30, 4  ;;  %s1847_s19 = int_to_ptr.vmem [resolvable:$false] %s1846_s19 }
  0x19   : > { %s411_s29 = scalar_lea.vmem %s2322_s0, %s1547_s20  ;;  %1632 = vmatpush3.bf16.msra.mxu1 %v1799_v9  ;;  %v1814_v9 = vld [vmem:[%s2325_s3 + $0x88] sm:$0xff]   ;;  %p1845_p13 = pneg %p1844_p12 }
  0x1a   : > { %v2041_v4 = vld [vmem:[%s411_s29] sm:$0xff]   ;;  %v2043_v5 = vld [vmem:[%s411_s29 + $0x8] sm:$0xff]   ;;  %1633 = vmatprep.subr.bf16.mxu1 %v1800_v19  ;;  %s1548_s29 = sshll.u32 %s1997_s25, 9  ;;  %s2281_s25 = scalar_lea.sflag [#allocation3], %s404_s23 }
  0x1b   : > { %1611 = vmatprep.mubr.msk.bf16.mxu0 %vm468_vm2, %v2041_v4  ;;  %v429_v6 = vshrl.u32 %v2041_v4, 16  ;;  %v432_v7 = vshll.u32 %v2041_v4, 16  ;;  %v436_v10 = vshrl.u32 %v2043_v5, 16  ;;  %v439_v11 = vshll.u32 %v2043_v5, 16  ;;  %s2277_s17 = scalar_lea.hbm %s2334_s12, %s1548_s29  ;;  %s1848_s20 = scalar_lea.vmem %s1847_s19, 1024 }
  0x1c   : > { %1612 = vmatmul.mubr.msk.bf16.vlgmr.msra.gmra.mrb[0].mxu0 %vm468_vm2, %v2043_v5  ;;  %p1849_p0 = scmp.lt.s32.totalorder %s2272_s28, %s1847_s19  ;;  %p1850_p1 = scmp.lt.s32.totalorder %s1848_s20, %s1842_s18 }
  0x1d   : > { %1616 = vmatpush3.bf16.msra.mxu0 %v1794_v1  ;;  %v431_v12 = vrot.slane %v429_v6, 7  ;;  %v448_v14 = vrot.slane %v432_v7, 1  ;;  %v438_v15 = vrot.slane %v436_v10, 7  ;;  %v450_v16 = vrot.slane %v439_v11, 1  ;;  %1634 = vmatpush3.bf16.msra.mxu1 %v1800_v19  ;;  %v1808_v1 = vld [vmem:[%s2325_s3 + $0x18] sm:$0xff]   ;;  %v1822_v19 = vld [vmem:[%s2327_s5 + $0x8] sm:$0xff]  }
  0x1e   : > { %1621 = vmatprep.subr.bf16.mxu0 %v1796_v2  ;;  %1635 = vmatprep.subr.bf16.mxu1 %v1801_v25  ;;  %p1851_p2 = por %p1850_p1, %p1849_p0 }
  0x1f   : > { %v434_v18 = vor.u32 %v432_v7, %v431_v12  ;;  %v452_v20 = vor.u32 %v450_v16, %v436_v10  ;;  %v441_v22 = vor.u32 %v439_v11, %v438_v15  ;;  %v449_v23 = vor.u32 %v448_v14, %v429_v6  ;;  %v1811_v6 = vld [vmem:[%s2325_s3 + $0x30] sm:$0xff]   ;;  %v1812_v7 = vld [vmem:[%s2325_s3 + $0x38] sm:$0xff]  }
  0x20   : > { %v1815_v10 = vld [vmem:[%s2325_s3 + $0x90] sm:$0xff]   ;;  %v1816_v11 = vld [vmem:[%s2325_s3 + $0x98] sm:$0xff]   ;;  %p1852_p3 = pnand %p1851_p2, %p1845_p13 }
  0x21   : > { %v446_v21 = vsel %vm2061_vm5, 0, %v434_v18  ;;  %v456_v24 = vsel %vm2067_vm6, %v452_v20, 0  ;;  %v442_v26 = vsel %vm427_vm0, %v431_v12, %v441_v22  ;;  %v451_v27 = vsel %vm447_vm1, %v449_v23, %v450_v16  ;;  %1636 = vmatpush3.bf16.msra.mxu1 %v1801_v25  ;;  %v1817_v12 = vld [vmem:[%s2325_s3 + $0xa0] sm:$0xff]   ;;  %v1819_v14 = vld [vmem:[%s2325_s3 + $0xb0] sm:$0xff]   ;;  %v1820_v15 = vld [vmem:[%s2325_s3 + $0xb8] sm:$0xff]  }
  0x22   : > { %1617 = vmatprep.mubr.msk.bf16.mxu0 %vm468_vm2, %v446_v21  ;;  %1637 = vmatprep.subr.bf16.mxu1 %v1802_v28  ;;  %v1823_v20 = vld [vmem:[%s2327_s5 + $0x10] sm:$0xff]   ;;  %v1825_v21 = vld [vmem:[%s2327_s5 + $0x20] sm:$0xff]   ;;  %v1826_v22 = vld [vmem:[%s2327_s5 + $0x28] sm:$0xff]  }
  0x23   : > { %v1827_v23 = vld [vmem:[%s2327_s5 + $0x30] sm:$0xff]  }
  0x25   : > { %1638 = vmatpush3.bf16.msra.mxu1 %v1802_v28 }
  0x26   : > { %1639 = vmatprep.subr.bf16.mxu1 %v1803_v29 }
  0x28   : > { %1618 = vmatmul.mubr.msk.bf16.vlgmr.msra.gmra.mrb[0].mxu0 %vm468_vm2, %v442_v26  ;;  %v1521_v26 = vld [vmem:[%s2326_s4] ss:$0 sm:$0xff] }
  0x29   : > { %1622 = vmatpush3.bf16.msra.mxu0 %v1796_v2  ;;  %1623 = vmatprep.mubr.msk.bf16.mxu0 %vm468_vm2, %v451_v27  ;;  %v1809_v2 = vld [vmem:[%s2325_s3 + $0x20] sm:$0xff]  }
  0x2a   : > { %1640 = vmatpush3.bf16.msra.mxu1 %v1803_v29  ;;  %1687 = vmatprep.subr.bf16.mxu0 %v1906_v33 }
  0x2b   : > { %1641 = vmatprep.subr.bf16.mxu1 %v1804_v30 }
  0x2e   : > { %1642 = vmatpush3.bf16.msra.mxu1 %v1804_v30 }
  0x2f   : > { %1647 = vmatprep.subr.bf16.mxu1 %v1805_v31 }
  0x34   : > { %1624 = vmatmul.mubr.msk.bf16.vlgmr.msra.gmra.mrb[0].mxu0 %vm468_vm2, %v456_v24  ;;  %v1828_v24 = vld [vmem:[%s2327_s5 + $0x38] sm:$0xff]  }
  0x35   : > { %1688 = vmatpush3.bf16.msra.mxu0 %v1821_v32  ;;  %1703 = vmatprep.mubr.msk.bf16.mxu0 %vm1907_vm7, %v1906_v33 }
  0x36   : > { %1689 = vmatprep.subr.bf16.mxu0 %v1906_v33 }
  0x39   : > { %1690 = vmatpush3.bf16.msra.mxu0 %v1822_v19 }
  0x3a   : > { %1691 = vmatprep.subr.bf16.mxu0 %v1906_v33 }
  0x3d   : > { %1692 = vmatpush3.bf16.msra.mxu0 %v1823_v20 }
  0x3e   : > { %1693 = vmatprep.subr.bf16.mxu0 %v1906_v33 }
  0x41   : > { %1694 = vmatpush3.bf16.msra.mxu0 %v1824_v17 }
  0x42   : > { %1695 = vmatprep.subr.bf16.mxu0 %v1906_v33 }
  0x45   : > { %1696 = vmatpush3.bf16.msra.mxu0 %v1825_v21 }
  0x46   : > { %1697 = vmatprep.subr.bf16.mxu0 %v1906_v33 }
  0x49   : > { %1698 = vmatpush3.bf16.msra.mxu0 %v1826_v22 }
  0x4a   : > { %1699 = vmatprep.subr.bf16.mxu0 %v1906_v33 }
  0x4d   : > { %1700 = vmatpush3.bf16.msra.mxu0 %v1827_v23 }
  0x4e   : > { %1701 = vmatprep.subr.bf16.mxu0 %v1906_v33 }
  0x51   : > { %1702 = vmatpush3.bf16.msra.mxu0 %v1828_v24 }
  0x52   : > { %1707 = vmatprep.subr.bf16.mxu0 %v1906_v33 }
 0x107   : > { %v1625_v35 = vpop.f32.mrb[0].mxu0 }
 0x108   : > { %v660_v36 = vadd.f32 %v1625_v35, %v1464_v34  ;;  %v632_v37 = vpop.f32.mrb[1].mxu0 }
 0x109   : > { %v658_v38 = vadd.f32 %v1464_v34, %v632_v37  ;;  %v1626_v39 = vpop.f32.mrb[2].mxu0 }
 0x10a   : > { %v661_v40 = vadd.f32 %v1626_v39, %v1464_v34  ;;  %v635_v41 = vpop.f32.mrb[3].mxu0  ;;  %v664_v43 = vmax.f32 %v660_v36, 0.0 }
 0x10b   : > { %v659_v42 = vadd.f32 %v1464_v34, %v635_v41  ;;  %v662_v45 = vmax.f32 %v658_v38, 0.0 }
 0x10c   : > { %v665_v44 = vmax.f32 %v661_v40, 0.0 }
 0x10d   : > { %v663_v46 = vmax.f32 %v659_v42, 0.0 }
 0x10e   : > { %v2107_v47 = vpack.c.bf16 %v665_v44, %v664_v43 }
 0x10f   : > { %v666_v48 = vpack.c.bf16 %v663_v46, %v662_v45  ;;  %v1829_v45 = vld [vmem:[%s2330_s8] sm:$0xff]  }
 0x110   : > { %v676_v49 = vshrl.u32 %v2107_v47, 16  ;;  %v679_v51 = vshll.u32 %v2107_v47, 16 }
 0x111   : > { %v669_v52 = vshrl.u32 %v666_v48, 16  ;;  %1643 = vmatprep.mubr.bf16.mxu1 %v666_v48  ;;  %v672_v53 = vshll.u32 %v666_v48, 16  ;;  %v1831_v48 = vld [vmem:[%s2330_s8 + $0x10] sm:$0xff]  }
 0x112   : > { %v678_v54 = vrot.slane %v676_v49, 7  ;;  %1644 = vmatmul.mubr.bf16.vlgmr.msra.gmra.mrb[0].mxu1 %v2107_v47  ;;  %v688_v61 = vrot.slane %v679_v51, 1  ;;  %v1830_v47 = vld [vmem:[%s2330_s8 + $0x8] sm:$0xff]  }
 0x113   : > { %1648 = vmatpush3.bf16.msra.mxu1 %v1805_v31  ;;  %v671_v55 = vrot.slane %v669_v52, 7  ;;  %v686_v56 = vrot.slane %v672_v53, 1 }
 0x114   : > { %1649 = vmatprep.subr.bf16.mxu1 %v1806_v50  ;;  %v681_v58 = vor.u32 %v679_v51, %v678_v54  ;;  %v690_v16 = vor.u32 %v688_v61, %v676_v49  ;;  %v1832_v49 = vld [vmem:[%s2330_s8 + $0x18] sm:$0xff]   ;;  %v1834_v51 = vld [vmem:[%s2330_s8 + $0x28] sm:$0xff]   ;;  %v1837_v54 = vld [vmem:[%s2332_s10] sm:$0xff]  }
 0x115   : > { %v674_v59 = vor.u32 %v672_v53, %v671_v55  ;;  %v687_v60 = vor.u32 %v686_v56, %v669_v52  ;;  %v1835_v52 = vld [vmem:[%s2330_s8 + $0x30] sm:$0xff]   ;;  %v1836_v53 = vld [vmem:[%s2330_s8 + $0x38] sm:$0xff]  }
 0x116   : > { %v682_v62 = vsel %vm427_vm0, %v671_v55, %v681_v58  ;;  %v693_v18 = vsel %vm2067_vm6, %v690_v16, 0  ;;  %v1078_v55 = vld [vmem:[%s2328_s6] sm:$0x1] }
 0x117   : > { %1650 = vmatpush3.bf16.msra.mxu1 %v1806_v50  ;;  %v685_v63 = vsel %vm2061_vm5, 0, %v674_v59  ;;  %v689_v0 = vsel %vm447_vm1, %v687_v60, %v688_v61  ;;  %v1833_v50 = vld [vmem:[%s2330_s8 + $0x20] sm:$0xff]  }
 0x118   : > { %1663 = vmatprep.mubr.bf16.mxu1 %v685_v63  ;;  %1651 = vmatprep.subr.bf16.mxu1 %v1807_v57 }
 0x11b   : > { %1652 = vmatpush3.bf16.msra.mxu1 %v1807_v57  ;;  %v1168_v57 = vld [vmem:[%s2329_s7] sm:$0x1] }
 0x11c   : > { %1653 = vmatprep.subr.bf16.mxu1 %v1808_v1 }
 0x11f   : > { %1654 = vmatpush3.bf16.msra.mxu1 %v1808_v1 }
 0x120   : > { %1655 = vmatprep.subr.bf16.mxu1 %v1809_v2 }
 0x123   : > { %1656 = vmatpush3.bf16.msra.mxu1 %v1809_v2 }
 0x124   : > { %1657 = vmatprep.subr.bf16.mxu1 %v1810_v3 }
 0x127   : > { %1658 = vmatpush3.bf16.msra.mxu1 %v1810_v3 }
 0x128   : > { %1659 = vmatprep.subr.bf16.mxu1 %v1811_v6 }
 0x12b   : > { %1660 = vmatpush3.bf16.msra.mxu1 %v1811_v6 }
 0x12c   : > { %1661 = vmatprep.subr.bf16.mxu1 %v1812_v7 }
 0x12f   : > { %1662 = vmatpush3.bf16.msra.mxu1 %v1812_v7 }
 0x130   : > { %1667 = vmatprep.subr.bf16.mxu1 %v1813_v8 }
 0x132   : > { %1664 = vmatmul.mubr.bf16.vlgmr.msra.gmra.mrb[0].mxu1 %v682_v62 }
 0x133   : > { %1668 = vmatpush3.bf16.msra.mxu1 %v1813_v8  ;;  %1683 = vmatprep.mubr.bf16.mxu1 %v689_v0  ;;  %v1188_v0 = vld [vmem:[%s2331_s9] sm:$0x1] }
 0x134   : > { %1669 = vmatprep.subr.bf16.mxu1 %v1814_v9 }
 0x137   : > { %1670 = vmatpush3.bf16.msra.mxu1 %v1814_v9 }
 0x138   : > { %1671 = vmatprep.subr.bf16.mxu1 %v1815_v10 }
 0x13b   : > { %1672 = vmatpush3.bf16.msra.mxu1 %v1815_v10 }
 0x13c   : > { %1673 = vmatprep.subr.bf16.mxu1 %v1816_v11 }
 0x13f   : > { %1674 = vmatpush3.bf16.msra.mxu1 %v1816_v11 }
 0x140   : > { %1675 = vmatprep.subr.bf16.mxu1 %v1817_v12 }
 0x143   : > { %1676 = vmatpush3.bf16.msra.mxu1 %v1817_v12 }
 0x144   : > { %1677 = vmatprep.subr.bf16.mxu1 %v1818_v13 }
 0x147   : > { %1678 = vmatpush3.bf16.msra.mxu1 %v1818_v13 }
 0x148   : > { %1679 = vmatprep.subr.bf16.mxu1 %v1819_v14 }
 0x14b   : > { %1680 = vmatpush3.bf16.msra.mxu1 %v1819_v14  ;;  %v1282_v14 = vlaneseq }
 0x14c   : > { %1681 = vmatprep.subr.bf16.mxu1 %v1820_v15 }
 0x14f   : > { %1682 = vmatpush3.bf16.msra.mxu1 %v1820_v15  ;;  %v1283_v15 = vshrl.u32 %v1282_v14, 7 }
 0x151   : > { %v1284_v16 = vsub.s32 0, %v1283_v15 }
 0x152   : > { %1684 = vmatmul.mubr.bf16.vlgmr.msra.gmra.mrb[0].mxu1 %v693_v18  ;;  %v1538_v18 = vld [vmem:[%s2333_s11] ss:$0 sm:$0xff] }
 0x225   : > { %v1685_v25 = vpop.f32.mrb[0].mxu1 }
 0x226   : > { %v1020_v27 = vpop.f32.mrb[1].mxu1  ;;  %v2204_v32 = vadd.f32 %v1685_v25, %v1521_v26 }
 0x227   : > { %v1686_v28 = vpop.f32.mrb[2].mxu1  ;;  %v2200_v30 = vadd.f32 %v1521_v26, %v1020_v27 }
 0x228   : > { %v1023_v29 = vpop.f32.mrb[3].mxu1  ;;  %v2208_v35 = vadd.f32 %v1686_v28, %v1521_v26 }
 0x229   : > { %v2202_v31 = vadd.f32 %v1521_v26, %v1023_v29 }
 0x22b   : > { %v1050_v34 = vadd.f32 %v2202_v31, %v2200_v30 }
 0x22d   : > { %v1051_v36 = vadd.f32 %v1050_v34, %v2204_v32 }
 0x22f   : > { %v1052_v37 = vadd.f32 %v1051_v36, %v2208_v35 }
 0x231   : > { %v1053_v38 = vrot.slane %v1052_v37, 4 }
 0x233   : > { %v1054_v39 = vadd.f32 %v1053_v38, %v1052_v37 }
 0x235   : > { %v1055_v40 = vrot.slane %v1054_v39, 2 }
 0x237   : > { %v1056_v41 = vadd.f32 %v1055_v40, %v1054_v39 }
 0x239   : > { %v1057_v42 = vrot.slane %v1056_v41, 1 }
 0x23b   : > { %v1058_v43 = vadd.f32 %v1057_v42, %v1056_v41 }
 0x23d   : > { %v1060_v44 = vmul.f32 0.03125, %v1058_v43 }
 0x23f   : > { %v1061_v46 = vpack.c.bf16 %v1060_v44, %v1060_v44 }
 0x241   : > { %1704 = vmatmul.mubr.bf16.vlgmr.msra.gmra.mrb[4].mxu0 %v1061_v46 }
 0x242   : > { %1708 = vmatpush3.bf16.msra.mxu0 %v1829_v45  ;;  %1723 = vmatprep.mubr.msk.bf16.mxu0 %vm1907_vm7, %v1906_v33 }
 0x243   : > { %1709 = vmatprep.subr.bf16.mxu0 %v1906_v33 }
 0x246   : > { %1710 = vmatpush3.bf16.msra.mxu0 %v1830_v47 }
 0x247   : > { %1711 = vmatprep.subr.bf16.mxu0 %v1906_v33 }
 0x24a   : > { %1712 = vmatpush3.bf16.msra.mxu0 %v1831_v48 }
 0x24b   : > { %1713 = vmatprep.subr.bf16.mxu0 %v1906_v33 }
 0x24e   : > { %1714 = vmatpush3.bf16.msra.mxu0 %v1832_v49 }
 0x24f   : > { %1715 = vmatprep.subr.bf16.mxu0 %v1906_v33 }
 0x252   : > { %1716 = vmatpush3.bf16.msra.mxu0 %v1833_v50 }
 0x253   : > { %1717 = vmatprep.subr.bf16.mxu0 %v1906_v33 }
 0x256   : > { %1718 = vmatpush3.bf16.msra.mxu0 %v1834_v51 }
 0x257   : > { %1719 = vmatprep.subr.bf16.mxu0 %v1906_v33 }
 0x25a   : > { %1720 = vmatpush3.bf16.msra.mxu0 %v1835_v52 }
 0x25b   : > { %1721 = vmatprep.subr.bf16.mxu0 %v1906_v33 }
 0x25e   : > { %1722 = vmatpush3.bf16.msra.mxu0 %v1836_v53 }
 0x25f   : > { %1727 = vmatprep.subr.bf16.mxu0 %v1837_v54 }
 0x314   : > { %v1161_v56 = vpop.f32.mrb[4].mxu0 }
 0x315   : > { %v1162_v33 = vadd.f32 %v1161_v56, %v1078_v55  ;;  %v1705_v58 = vpop.f32.mrb[5].mxu0 }
 0x316   : > { %v1164_v59 = vpop.f32.mrb[6].mxu0 }
 0x317   : > { %vm1167_vm8 = vcmp.ge.f32.partialorder %v1162_v33, 0.0  ;;  %v1169_v60 = vmul.f32 %v1168_v57, %v1162_v33  ;;  %v1706_v61 = vpop.f32.mrb[7].mxu0 }
 0x319   : > { %v1170_v62 = vsel %vm1167_vm8, %v1162_v33, %v1169_v60 }
 0x31a   : > { %v1171_v63 = vpack.c.bf16 %v1170_v62, %v1170_v62 }
 0x31c   : > { %1724 = vmatmul.mubr.bf16.vlgmr.msra.gmra.mrb[8].mxu0 %v1171_v63 }
 0x31d   : > { %1728 = vmatpush3.bf16.msra.mxu0 %v1837_v54  ;;  %1729 = vmatprep.mubr.msk.bf16.mxu0 %vm468_vm2, %v2041_v4 }
 0x324   : > { %1730 = vmatmul.mubr.msk.bf16.vlgmr.msra.gmra.mrb[12].mxu0 %vm468_vm2, %v2043_v5 }
 0x3ef   : > { %v1271_v1 = vpop.f32.mrb[8].mxu0 }
 0x3f0   : > { %v1272_v2 = vadd.f32 %v1271_v1, %v1188_v0  ;;  %v1725_v3 = vpop.f32.mrb[9].mxu0 }
 0x3f1   : > { %v1274_v6 = vpop.f32.mrb[10].mxu0 }
 0x3f2   : > { %v1277_v7 = vsub.f32 0.0, %v1272_v2  ;;  %v1726_v8 = vpop.f32.mrb[11].mxu0 }
 0x3f4   : > { %v1278_v9 = vmul.f32 1.442695, %v1277_v7 }
 0x3f6   : > { %1838 = vpow2.f32 %v1278_v9 }
 0x3f7   : > { %v1731_v10 = vpop.f32.mrb[12].mxu0 }
 0x3f8   : > { %v1339_v11 = vpop.f32.mrb[13].mxu0  ;;  %v1348_v17 = vadd.f32 %v1731_v10, %v1538_v18 }
 0x3f9   : > { %v1732_v4 = vpop.f32.mrb[14].mxu0  ;;  %v1340_v21 = vadd.f32 %v1538_v18, %v1339_v11 }
 0x3fa   : > { %v1342_v12 = vpop.f32.mrb[15].mxu0  ;;  %v1351_v22 = vadd.f32 %v1732_v4, %v1538_v18 }
 0x3fb   : > { %v1343_v23 = vadd.f32 %v1538_v18, %v1342_v12 }
 0x400   : > { %v1839_v13 = vpop.eup %1838 }
 0x401   : > { %v1280_v5 = vadd.f32 1.0, %v1839_v13 }
 0x403   : > { %1840 = vrcp.f32 %v1280_v5 }
 0x40d   : > { %v1841_v19 = vpop.eup %1840 }
 0x40e   : > { %v1285_v20 = vrot.slane %v1841_v19, %v1284_v16 }
 0x410   : > { %v1288_v24 = vmul.f32 %v1285_v20, %v2204_v32  ;;  %v1286_v25 = vmul.f32 %v1285_v20, %v2200_v30  ;;  %v1289_v26 = vmul.f32 %v1285_v20, %v2208_v35  ;;  %v1287_v27 = vmul.f32 %v1285_v20, %v2202_v31 }
 0x412   : > { %v1356_v28 = vadd.f32 %v1348_v17, %v1288_v24  ;;  %v1354_v29 = vadd.f32 %v1340_v21, %v1286_v25  ;;  %v1357_v34 = vadd.f32 %v1351_v22, %v1289_v26  ;;  %v1355_v36 = vadd.f32 %v1343_v23, %v1287_v27 }
 0x414   : > { %v1360_v30 = vmax.f32 %v1356_v28, 0.0  ;;  %v1358_v32 = vmax.f32 %v1354_v29, 0.0  ;;  %v1361_v31 = vmax.f32 %v1357_v34, 0.0  ;;  %v1359_v35 = vmax.f32 %v1355_v36, 0.0 }
 0x416   : > { %1364 = vst [vmem:[%s406_s26 + $0x10] sm:$0xff] %v1360_v30  ;;  %1362 = vst [vmem:[%s406_s26] sm:$0xff] %v1358_v32 }
 0x417   : > { %1365 = vst [vmem:[%s406_s26 + $0x18] sm:$0xff] %v1361_v31  ;;  %1363 = vst [vmem:[%s406_s26 + $0x8] sm:$0xff] %v1359_v35 }
 0x418   : > { %1855 = shalt.err (!%p1852_p3)
}
 0x419   : > { %s1856_s23 = scalar_lea.hbm %s2277_s17, 512  ;;  %s1860_s15 = scalar_lea.hbm %s2334_s12, 1024 }
 0x41a   : > { %p1857_p4 = scmp.ne.s32.totalorder %s2277_s17, %s1856_s23  ;;  %p1861_p9 = scmp.lt.u32.totalorder %s2277_s17, %s2334_s12 }
 0x41b   : > { %p1862_p10 = scmp.lt.u32.totalorder %s1860_s15, %s1856_s23  ;;  %p1864_p12 = scmp.lt.u32.totalorder %s1856_s23, %s2277_s17 }
 0x41c   : > { %p1858_p7 = pnand %p1857_p4, %p2014_p5 }
 0x41d   : > { %p1863_p11 = por %p1862_p10, %p1861_p9 }
 0x41e   : > { %p1859_p8 = pneg %p1858_p7 }
 0x41f   : > { %p1865_p13 = por %p1864_p12, %p1863_p11 }
 0x421   : > { %p1866_p0 = pnand %p1865_p13, %p1859_p8 }
 0x423   : > { %1869 = shalt.err (!%p1866_p0)
}
 0x424   : > { %s1909_s18 = smov 128   ;;  %s1910_s19 = smov 8  }
 0x425   : > { %1749 = dma.vmem_to_hbm [thread:$0]  (%p2014_p5), %s2272_s28, 512, %s2277_s17, %s2281_s25, %s1909_s18, %s1909_s18, %s1910_s19  }
 0x426 PF: > { %p1755_p1 = scmp.ge.s32.totalorder %s1904_s24, 2  ;;  %s1395_s20 = sand.u32 1, %s1892_s21  }
 0x427   : > { %s1396_s23 = scalar_lea.sflag [#allocation3], %s1395_s20 }
 0x428   : > { %p1752_p2 = pnand %p1755_p1, %p2018_p6 }
 0x42a   : > { %1887 = dma.done.wait (!%p1752_p2), %s1396_s23, 512  }
 0x42b   : > { %1889 = vsyncadd (!%p1752_p2), %s1396_s23, 4294966784  ;;  %s2344_s26 = sld [smem:[#allocation5_spill]]  ;;  %s2345_s23 = sld [smem:[#allocation6_spill]] }
 0x42c   : > { %p22_p3 = scmp.ge.s32.totalorder %s2001_s27, 4   ;;  %s2346_s21 = smov %s1896_s22 }
 0x42d   : > { %s2348_s24 = smov %s2001_s27 }
 0x42e   :  { %24 = sbr.rel (!%p22_p3) target bundleno = 3 (0x3), region = 107 }
 0x431   : > { %s2347_s22 = smov %s2344_s26 }
 0x435   :  { %1401 = vsyncpa [#allocation3], 1 }
 0x436   :  { %1403 = vsyncpa [#allocation3 + $0x1], 1 }

</bundles_post_ra>
